<compile_context>
chip_gen: v6e
topology: v6e:2x2x1
jax: 0.10.0
libtpu: 0.0.40
codegen_flags: <defaults>
</compile_context>

<pallas_src>
import functools

import numpy as np
import jax
import jax.numpy as jnp
from jax import lax
from jax.experimental import pallas as pl
from jax.experimental.pallas import tpu as pltpu

GROUP_SIZE_GN = 2   # norm == "gn" path of ConvBlock
GN_EPS = 1e-5


def _convblock_kernel(x_ref, w_ref, gb_ref, mask_ref, o_ref, *,
                      w_in, kh, kw, groups, eps, inv_count):
    # x_ref:    (N, Cin, HWp)      f32, HWp = H*W (padded flat spatial, multiple of 128)
    # w_ref:    (KH*KW, Cout, Cin) f32, tap-major conv weights
    # gb_ref:   (Cout, 2)          f32, [:,0]=gamma, [:,1]=beta
    # mask_ref: (1, HWp)           f32, 1.0 on valid (Ho x Wo) output positions
    # o_ref:    (N, Cout, HWp)     f32
    n_batch = x_ref.shape[0]
    cout, hwp = o_ref.shape[1], o_ref.shape[2]
    cg = cout // groups

    gamma = gb_ref[:, 0:1]                                   # (Cout, 1)
    beta = gb_ref[:, 1:2]                                    # (Cout, 1)
    valid_f = mask_ref[...]                                  # (1, HWp)
    ch_ids = lax.broadcasted_iota(jnp.int32, (cout, 1), 0)   # channel index column

    for n in range(n_batch):                                 # N is tiny & static
        x_n = x_ref[n]                                       # (Cin, HWp)

        # --- conv: accumulate the KH*KW taps as small MXU matmuls over rolled views ---
        acc = jnp.zeros((cout, hwp), jnp.float32)
        t = 0
        for ih in range(kh):
            for iw in range(kw):
                s = ih * w_in + iw
                tap = x_n if s == 0 else pltpu.roll(x_n, hwp - s, axis=1)
                acc = acc + jnp.dot(w_ref[t], tap, preferred_element_type=jnp.float32)
                t += 1

        # --- one-pass GroupNorm stats (padded lanes masked out, true count in denom) ---
        acc_m = acc * valid_f
        row_sum = jnp.sum(acc_m, axis=1, keepdims=True)          # (Cout, 1)
        row_sq = jnp.sum(acc_m * acc_m, axis=1, keepdims=True)   # (Cout, 1)

        mean_ch = jnp.zeros((cout, 1), jnp.float32)
        ex2_ch = jnp.zeros((cout, 1), jnp.float32)
        for g in range(groups):                                  # groups=2, static
            lo, hi = g * cg, (g + 1) * cg
            m_g = jnp.sum(row_sum[lo:hi, :], axis=0, keepdims=True) * inv_count  # (1,1)
            e_g = jnp.sum(row_sq[lo:hi, :], axis=0, keepdims=True) * inv_count   # (1,1)
            in_g = (ch_ids >= lo) & (ch_ids < hi)
            mean_ch = jnp.where(in_g, m_g, mean_ch)
            ex2_ch = jnp.where(in_g, e_g, ex2_ch)

        var_ch = jnp.maximum(ex2_ch - mean_ch * mean_ch, 0.0)
        inv_std = lax.rsqrt(var_ch + eps)
        scale = inv_std * gamma                                  # (Cout, 1)
        shift = beta - mean_ch * scale                           # (Cout, 1)

        # --- fused affine + ReLU on the full tile, single unmasked store per sample ---
        # TODO(synk): Dropout(p=dropout_value) is identity here (dropout_value=0 / eval).
        y = jnp.maximum(acc * scale + shift, 0.0) * valid_f
        o_ref[n] = y.astype(o_ref.dtype)


def conv_block_forward(x_nchw, w_oihw, gamma, beta, *, groups=GROUP_SIZE_GN, eps=GN_EPS):
    """ConvBlock forward: Conv2d(valid, no bias) -> GroupNorm(groups) -> ReLU -> Dropout(0)."""
    N, Cin, H, W = x_nchw.shape
    Cout, Cin2, KH, KW = w_oihw.shape
    assert Cin == Cin2 and Cout % groups == 0
    Ho, Wo = H - KH + 1, W - KW + 1
    HWp = H * W                                   # padded flat spatial (multiple of 128 here)

    # Minimal wrapper prep (all tiny / free):
    x_flat = x_nchw.reshape(N, Cin, HWp).astype(jnp.float32)                # contiguous reshape
    # tap-major weights: w_taps[t, co, ci] = w[co, ci, ih, iw], t = ih*KW + iw
    w_taps = jnp.transpose(w_oihw, (2, 3, 0, 1)).reshape(KH * KW, Cout, Cin).astype(jnp.float32)
    gb = jnp.stack([gamma.astype(jnp.float32), beta.astype(jnp.float32)], axis=1)  # (Cout, 2)

    # static validity mask over the padded HxW grid (compile-time numpy constant)
    mgrid = np.zeros((H, W), np.float32)
    mgrid[:Ho, :Wo] = 1.0
    mask = jnp.asarray(mgrid.reshape(1, HWp))

    kernel = functools.partial(
        _convblock_kernel, w_in=W, kh=KH, kw=KW, groups=groups, eps=eps,
        inv_count=1.0 / float(Ho * Wo * (Cout // groups)))

    cost = pl.CostEstimate(
        flops=2 * N * Cout * (KH * KW * Cin) * HWp + 8 * N * Cout * HWp,
        transcendentals=N * groups,
        bytes_accessed=4 * (x_flat.size + w_taps.size + gb.size + mask.size + N * Cout * HWp),
    )

    out = pl.pallas_call(
        kernel,
        out_shape=jax.ShapeDtypeStruct((N, Cout, HWp), jnp.float32),
        cost_estimate=cost,
    )(x_flat, w_taps, gb, mask)

    # (N, Cout, H*W) padded NCHW order -> reshape (free) + one cheap slice to (Ho, Wo)
    return out.reshape(N, Cout, H, W)[:, :, :Ho, :Wo]


def _reference(x_nchw, w_oihw, gamma, beta, groups=GROUP_SIZE_GN, eps=GN_EPS):
    """Pure-JAX f32 reference mirroring the PyTorch module."""
    y = lax.conv_general_dilated(
        x_nchw, w_oihw, window_strides=(1, 1), padding="VALID",
        dimension_numbers=("NCHW", "OIHW", "NCHW"),
        precision=lax.Precision.HIGHEST,
        preferred_element_type=jnp.float32)
    N, C, Hh, Ww = y.shape
    yg = y.reshape(N, groups, -1)
    m = jnp.mean(yg, axis=-1, keepdims=True)
    v = jnp.mean((yg - m) ** 2, axis=-1, keepdims=True)
    yn = ((yg - m) * lax.rsqrt(v + eps)).reshape(N, C, Hh, Ww)
    yn = yn * gamma.reshape(1, C, 1, 1) + beta.reshape(1, C, 1, 1)
    return jnp.maximum(yn, 0.0)


if __name__ == "__main__":
    key = jax.random.PRNGKey(0)
    k1, k2, k3, k4 = jax.random.split(key, 4)

    # ConvBlock(in_channels=4, out_channels=8, norm="gn", kernel_size=(3,3), dilation=1)
    N, Cin, H, W = 2, 4, 16, 16
    Cout, KH, KW = 8, 3, 3

    x = jax.random.normal(k1, (N, Cin, H, W), dtype=jnp.float32)
    w = jax.random.normal(k2, (Cout, Cin, KH, KW), dtype=jnp.float32) * 0.2
    gamma = 1.0 + 0.1 * jax.random.normal(k3, (Cout,), dtype=jnp.float32)
    beta = 0.1 * jax.random.normal(k4, (Cout,), dtype=jnp.float32)

    out = jax.block_until_ready(conv_block_forward(x, w, gamma, beta))
    ref = _reference(x, w, gamma, beta)

    assert out.shape == (N, Cout, H - KH + 1, W - KW + 1)
    assert jnp.allclose(out, ref, atol=2e-3, rtol=2e-3), "mismatch vs reference"

    print("KERNEL_OK")
</pallas_src>

<mosaic_0001>
module attributes {stable_mosaic.version = 11 : i64} {
  func.func @_convblock_kernel(%arg0: memref<2x4x256xf32, #tpu.memory_space<vmem>>, %arg1: memref<9x8x4xf32, #tpu.memory_space<vmem>>, %arg2: memref<8x2xf32, #tpu.memory_space<vmem>>, %arg3: memref<1x256xf32, #tpu.memory_space<vmem>>, %arg4: memref<2x8x256xf32, #tpu.memory_space<vmem>>) attributes {dimension_semantics = [], scalar_prefetch = 0 : i64, scratch_operands = 0 : i64, tpu.core_type = #tpu.core_type<tc>} {
    %c0 = arith.constant 0 : index
    %c0_0 = arith.constant 0 : index
    %0 = vector.load %arg2[%c0, %c0_0] : memref<8x2xf32, #tpu.memory_space<vmem>>, vector<8x1xf32>
    %c0_1 = arith.constant 0 : index
    %c1 = arith.constant 1 : index
    %1 = vector.load %arg2[%c0_1, %c1] : memref<8x2xf32, #tpu.memory_space<vmem>>, vector<8x1xf32>
    %c0_2 = arith.constant 0 : index
    %c0_3 = arith.constant 0 : index
    %2 = vector.load %arg3[%c0_2, %c0_3] : memref<1x256xf32, #tpu.memory_space<vmem>>, vector<1x256xf32>
    %3 = tpu.iota {dimensions = array<i32: 0>} : vector<8x1xi32>
    %c0_4 = arith.constant 0 : index
    %c0_5 = arith.constant 0 : index
    %c0_6 = arith.constant 0 : index
    %4 = vector.load %arg0[%c0_4, %c0_5, %c0_6] : memref<2x4x256xf32, #tpu.memory_space<vmem>>, vector<1x4x256xf32>
    %5 = vector.shape_cast %4 : vector<1x4x256xf32> to vector<4x256xf32>
    %cst = arith.constant 0.000000e+00 : f32
    %6 = vector.broadcast %cst : f32 to vector<8x256xf32>
    %c0_7 = arith.constant 0 : index
    %c0_8 = arith.constant 0 : index
    %c0_9 = arith.constant 0 : index
    %7 = vector.load %arg1[%c0_7, %c0_8, %c0_9] : memref<9x8x4xf32, #tpu.memory_space<vmem>>, vector<1x8x4xf32>
    %8 = vector.shape_cast %7 : vector<1x8x4xf32> to vector<8x4xf32>
    %cst_10 = arith.constant dense<0.000000e+00> : vector<8x256xf32>
    %9 = tpu.matmul %8, %5, %cst_10 {dimension_numbers = #tpu.dot_dimension_numbers<[1], [0], [0], [1], [0, 0, 1, 1], [], []>} : vector<8x4xf32>, vector<4x256xf32>, vector<8x256xf32> -> vector<8x256xf32>
    %10 = arith.addf %6, %9 : vector<8x256xf32>
    %c255_i32 = arith.constant 255 : i32
    %11 = tpu.dynamic_rotate %5 by %c255_i32 dim 1 : vector<4x256xf32>, i32 -> vector<4x256xf32>
    %c1_11 = arith.constant 1 : index
    %c0_12 = arith.constant 0 : index
    %c0_13 = arith.constant 0 : index
    %12 = vector.load %arg1[%c1_11, %c0_12, %c0_13] : memref<9x8x4xf32, #tpu.memory_space<vmem>>, vector<1x8x4xf32>
    %13 = vector.shape_cast %12 : vector<1x8x4xf32> to vector<8x4xf32>
    %cst_14 = arith.constant dense<0.000000e+00> : vector<8x256xf32>
    %14 = tpu.matmul %13, %11, %cst_14 {dimension_numbers = #tpu.dot_dimension_numbers<[1], [0], [0], [1], [0, 0, 1, 1], [], []>} : vector<8x4xf32>, vector<4x256xf32>, vector<8x256xf32> -> vector<8x256xf32>
    %15 = arith.addf %10, %14 : vector<8x256xf32>
    %c254_i32 = arith.constant 254 : i32
    %16 = tpu.dynamic_rotate %5 by %c254_i32 dim 1 : vector<4x256xf32>, i32 -> vector<4x256xf32>
    %c2 = arith.constant 2 : index
    %c0_15 = arith.constant 0 : index
    %c0_16 = arith.constant 0 : index
    %17 = vector.load %arg1[%c2, %c0_15, %c0_16] : memref<9x8x4xf32, #tpu.memory_space<vmem>>, vector<1x8x4xf32>
    %18 = vector.shape_cast %17 : vector<1x8x4xf32> to vector<8x4xf32>
    %cst_17 = arith.constant dense<0.000000e+00> : vector<8x256xf32>
    %19 = tpu.matmul %18, %16, %cst_17 {dimension_numbers = #tpu.dot_dimension_numbers<[1], [0], [0], [1], [0, 0, 1, 1], [], []>} : vector<8x4xf32>, vector<4x256xf32>, vector<8x256xf32> -> vector<8x256xf32>
    %20 = arith.addf %15, %19 : vector<8x256xf32>
    %c240_i32 = arith.constant 240 : i32
    %21 = tpu.dynamic_rotate %5 by %c240_i32 dim 1 : vector<4x256xf32>, i32 -> vector<4x256xf32>
    %c3 = arith.constant 3 : index
    %c0_18 = arith.constant 0 : index
    %c0_19 = arith.constant 0 : index
    %22 = vector.load %arg1[%c3, %c0_18, %c0_19] : memref<9x8x4xf32, #tpu.memory_space<vmem>>, vector<1x8x4xf32>
    %23 = vector.shape_cast %22 : vector<1x8x4xf32> to vector<8x4xf32>
    %cst_20 = arith.constant dense<0.000000e+00> : vector<8x256xf32>
    %24 = tpu.matmul %23, %21, %cst_20 {dimension_numbers = #tpu.dot_dimension_numbers<[1], [0], [0], [1], [0, 0, 1, 1], [], []>} : vector<8x4xf32>, vector<4x256xf32>, vector<8x256xf32> -> vector<8x256xf32>
    %25 = arith.addf %20, %24 : vector<8x256xf32>
    %c239_i32 = arith.constant 239 : i32
    %26 = tpu.dynamic_rotate %5 by %c239_i32 dim 1 : vector<4x256xf32>, i32 -> vector<4x256xf32>
    %c4 = arith.constant 4 : index
    %c0_21 = arith.constant 0 : index
    %c0_22 = arith.constant 0 : index
    %27 = vector.load %arg1[%c4, %c0_21, %c0_22] : memref<9x8x4xf32, #tpu.memory_space<vmem>>, vector<1x8x4xf32>
    %28 = vector.shape_cast %27 : vector<1x8x4xf32> to vector<8x4xf32>
    %cst_23 = arith.constant dense<0.000000e+00> : vector<8x256xf32>
    %29 = tpu.matmul %28, %26, %cst_23 {dimension_numbers = #tpu.dot_dimension_numbers<[1], [0], [0], [1], [0, 0, 1, 1], [], []>} : vector<8x4xf32>, vector<4x256xf32>, vector<8x256xf32> -> vector<8x256xf32>
    %30 = arith.addf %25, %29 : vector<8x256xf32>
    %c238_i32 = arith.constant 238 : i32
    %31 = tpu.dynamic_rotate %5 by %c238_i32 dim 1 : vector<4x256xf32>, i32 -> vector<4x256xf32>
    %c5 = arith.constant 5 : index
    %c0_24 = arith.constant 0 : index
    %c0_25 = arith.constant 0 : index
    %32 = vector.load %arg1[%c5, %c0_24, %c0_25] : memref<9x8x4xf32, #tpu.memory_space<vmem>>, vector<1x8x4xf32>
    %33 = vector.shape_cast %32 : vector<1x8x4xf32> to vector<8x4xf32>
    %cst_26 = arith.constant dense<0.000000e+00> : vector<8x256xf32>
    %34 = tpu.matmul %33, %31, %cst_26 {dimension_numbers = #tpu.dot_dimension_numbers<[1], [0], [0], [1], [0, 0, 1, 1], [], []>} : vector<8x4xf32>, vector<4x256xf32>, vector<8x256xf32> -> vector<8x256xf32>
    %35 = arith.addf %30, %34 : vector<8x256xf32>
    %c224_i32 = arith.constant 224 : i32
    %36 = tpu.dynamic_rotate %5 by %c224_i32 dim 1 : vector<4x256xf32>, i32 -> vector<4x256xf32>
    %c6 = arith.constant 6 : index
    %c0_27 = arith.constant 0 : index
    %c0_28 = arith.constant 0 : index
    %37 = vector.load %arg1[%c6, %c0_27, %c0_28] : memref<9x8x4xf32, #tpu.memory_space<vmem>>, vector<1x8x4xf32>
    %38 = vector.shape_cast %37 : vector<1x8x4xf32> to vector<8x4xf32>
    %cst_29 = arith.constant dense<0.000000e+00> : vector<8x256xf32>
    %39 = tpu.matmul %38, %36, %cst_29 {dimension_numbers = #tpu.dot_dimension_numbers<[1], [0], [0], [1], [0, 0, 1, 1], [], []>} : vector<8x4xf32>, vector<4x256xf32>, vector<8x256xf32> -> vector<8x256xf32>
    %40 = arith.addf %35, %39 : vector<8x256xf32>
    %c223_i32 = arith.constant 223 : i32
    %41 = tpu.dynamic_rotate %5 by %c223_i32 dim 1 : vector<4x256xf32>, i32 -> vector<4x256xf32>
    %c7 = arith.constant 7 : index
    %c0_30 = arith.constant 0 : index
    %c0_31 = arith.constant 0 : index
    %42 = vector.load %arg1[%c7, %c0_30, %c0_31] : memref<9x8x4xf32, #tpu.memory_space<vmem>>, vector<1x8x4xf32>
    %43 = vector.shape_cast %42 : vector<1x8x4xf32> to vector<8x4xf32>
    %cst_32 = arith.constant dense<0.000000e+00> : vector<8x256xf32>
    %44 = tpu.matmul %43, %41, %cst_32 {dimension_numbers = #tpu.dot_dimension_numbers<[1], [0], [0], [1], [0, 0, 1, 1], [], []>} : vector<8x4xf32>, vector<4x256xf32>, vector<8x256xf32> -> vector<8x256xf32>
    %45 = arith.addf %40, %44 : vector<8x256xf32>
    %c222_i32 = arith.constant 222 : i32
    %46 = tpu.dynamic_rotate %5 by %c222_i32 dim 1 : vector<4x256xf32>, i32 -> vector<4x256xf32>
    %c8 = arith.constant 8 : index
    %c0_33 = arith.constant 0 : index
    %c0_34 = arith.constant 0 : index
    %47 = vector.load %arg1[%c8, %c0_33, %c0_34] : memref<9x8x4xf32, #tpu.memory_space<vmem>>, vector<1x8x4xf32>
    %48 = vector.shape_cast %47 : vector<1x8x4xf32> to vector<8x4xf32>
    %cst_35 = arith.constant dense<0.000000e+00> : vector<8x256xf32>
    %49 = tpu.matmul %48, %46, %cst_35 {dimension_numbers = #tpu.dot_dimension_numbers<[1], [0], [0], [1], [0, 0, 1, 1], [], []>} : vector<8x4xf32>, vector<4x256xf32>, vector<8x256xf32> -> vector<8x256xf32>
    %50 = arith.addf %45, %49 : vector<8x256xf32>
    %51 = vector.broadcast %2 : vector<1x256xf32> to vector<8x256xf32>
    %52 = arith.mulf %50, %51 : vector<8x256xf32>
    %cst_36 = arith.constant dense<0.000000e+00> : vector<8xf32>
    %53 = vector.multi_reduction <add>, %52, %cst_36 [1] : vector<8x256xf32> to vector<8xf32>
    %54 = vector.shape_cast %53 : vector<8xf32> to vector<8x1xf32>
    %55 = arith.mulf %52, %52 : vector<8x256xf32>
    %cst_37 = arith.constant dense<0.000000e+00> : vector<8xf32>
    %56 = vector.multi_reduction <add>, %55, %cst_37 [1] : vector<8x256xf32> to vector<8xf32>
    %57 = vector.shape_cast %56 : vector<8xf32> to vector<8x1xf32>
    %cst_38 = arith.constant 0.000000e+00 : f32
    %58 = vector.broadcast %cst_38 : f32 to vector<8x1xf32>
    %cst_39 = arith.constant 0.000000e+00 : f32
    %59 = vector.broadcast %cst_39 : f32 to vector<8x1xf32>
    %60 = vector.extract_strided_slice %54 {offsets = [0, 0], sizes = [4, 1], strides = [1, 1]} : vector<8x1xf32> to vector<4x1xf32>
    %cst_40 = arith.constant dense<0.000000e+00> : vector<1xf32>
    %61 = vector.multi_reduction <add>, %60, %cst_40 [0] : vector<4x1xf32> to vector<1xf32>
    %62 = vector.shape_cast %61 : vector<1xf32> to vector<1x1xf32>
    %cst_41 = arith.constant 0.00127551018 : f32
    %63 = vector.broadcast %cst_41 : f32 to vector<1x1xf32>
    %64 = arith.mulf %62, %63 : vector<1x1xf32>
    %65 = vector.extract_strided_slice %57 {offsets = [0, 0], sizes = [4, 1], strides = [1, 1]} : vector<8x1xf32> to vector<4x1xf32>
    %cst_42 = arith.constant dense<0.000000e+00> : vector<1xf32>
    %66 = vector.multi_reduction <add>, %65, %cst_42 [0] : vector<4x1xf32> to vector<1xf32>
    %67 = vector.shape_cast %66 : vector<1xf32> to vector<1x1xf32>
    %cst_43 = arith.constant 0.00127551018 : f32
    %68 = vector.broadcast %cst_43 : f32 to vector<1x1xf32>
    %69 = arith.mulf %67, %68 : vector<1x1xf32>
    %c0_i32 = arith.constant 0 : i32
    %70 = vector.broadcast %c0_i32 : i32 to vector<8x1xi32>
    %71 = arith.cmpi sge, %3, %70 : vector<8x1xi32>
    %c4_i32 = arith.constant 4 : i32
    %72 = vector.broadcast %c4_i32 : i32 to vector<8x1xi32>
    %73 = arith.cmpi slt, %3, %72 : vector<8x1xi32>
    %74 = arith.andi %71, %73 : vector<8x1xi1>
    %75 = vector.shape_cast %64 : vector<1x1xf32> to vector<1x1xf32>
    %76 = vector.broadcast %75 : vector<1x1xf32> to vector<8x1xf32>
    %77 = arith.select %74, %76, %58 : vector<8x1xi1>, vector<8x1xf32>
    %78 = vector.shape_cast %69 : vector<1x1xf32> to vector<1x1xf32>
    %79 = vector.broadcast %78 : vector<1x1xf32> to vector<8x1xf32>
    %80 = arith.select %74, %79, %59 : vector<8x1xi1>, vector<8x1xf32>
    %81 = vector.extract_strided_slice %54 {offsets = [4, 0], sizes = [4, 1], strides = [1, 1]} : vector<8x1xf32> to vector<4x1xf32>
    %cst_44 = arith.constant dense<0.000000e+00> : vector<1xf32>
    %82 = vector.multi_reduction <add>, %81, %cst_44 [0] : vector<4x1xf32> to vector<1xf32>
    %83 = vector.shape_cast %82 : vector<1xf32> to vector<1x1xf32>
    %cst_45 = arith.constant 0.00127551018 : f32
    %84 = vector.broadcast %cst_45 : f32 to vector<1x1xf32>
    %85 = arith.mulf %83, %84 : vector<1x1xf32>
    %86 = vector.extract_strided_slice %57 {offsets = [4, 0], sizes = [4, 1], strides = [1, 1]} : vector<8x1xf32> to vector<4x1xf32>
    %cst_46 = arith.constant dense<0.000000e+00> : vector<1xf32>
    %87 = vector.multi_reduction <add>, %86, %cst_46 [0] : vector<4x1xf32> to vector<1xf32>
    %88 = vector.shape_cast %87 : vector<1xf32> to vector<1x1xf32>
    %cst_47 = arith.constant 0.00127551018 : f32
    %89 = vector.broadcast %cst_47 : f32 to vector<1x1xf32>
    %90 = arith.mulf %88, %89 : vector<1x1xf32>
    %c4_i32_48 = arith.constant 4 : i32
    %91 = vector.broadcast %c4_i32_48 : i32 to vector<8x1xi32>
    %92 = arith.cmpi sge, %3, %91 : vector<8x1xi32>
    %c8_i32 = arith.constant 8 : i32
    %93 = vector.broadcast %c8_i32 : i32 to vector<8x1xi32>
    %94 = arith.cmpi slt, %3, %93 : vector<8x1xi32>
    %95 = arith.andi %92, %94 : vector<8x1xi1>
    %96 = vector.shape_cast %85 : vector<1x1xf32> to vector<1x1xf32>
    %97 = vector.broadcast %96 : vector<1x1xf32> to vector<8x1xf32>
    %98 = arith.select %95, %97, %77 : vector<8x1xi1>, vector<8x1xf32>
    %99 = vector.shape_cast %90 : vector<1x1xf32> to vector<1x1xf32>
    %100 = vector.broadcast %99 : vector<1x1xf32> to vector<8x1xf32>
    %101 = arith.select %95, %100, %80 : vector<8x1xi1>, vector<8x1xf32>
    %102 = arith.mulf %98, %98 : vector<8x1xf32>
    %103 = arith.subf %101, %102 : vector<8x1xf32>
    %cst_49 = arith.constant 0.000000e+00 : f32
    %104 = vector.broadcast %cst_49 : f32 to vector<8x1xf32>
    %105 = arith.maximumf %103, %104 : vector<8x1xf32>
    %cst_50 = arith.constant 9.99999974E-6 : f32
    %106 = vector.broadcast %cst_50 : f32 to vector<8x1xf32>
    %107 = arith.addf %105, %106 : vector<8x1xf32>
    %108 = math.rsqrt %107 : vector<8x1xf32>
    %109 = arith.mulf %108, %0 : vector<8x1xf32>
    %110 = arith.mulf %98, %109 : vector<8x1xf32>
    %111 = arith.subf %1, %110 : vector<8x1xf32>
    %112 = vector.broadcast %109 : vector<8x1xf32> to vector<8x256xf32>
    %113 = arith.mulf %50, %112 : vector<8x256xf32>
    %114 = vector.broadcast %111 : vector<8x1xf32> to vector<8x256xf32>
    %115 = arith.addf %113, %114 : vector<8x256xf32>
    %cst_51 = arith.constant 0.000000e+00 : f32
    %116 = vector.broadcast %cst_51 : f32 to vector<8x256xf32>
    %117 = arith.maximumf %115, %116 : vector<8x256xf32>
    %118 = vector.broadcast %2 : vector<1x256xf32> to vector<8x256xf32>
    %119 = arith.mulf %117, %118 : vector<8x256xf32>
    %c0_52 = arith.constant 0 : index
    %c0_53 = arith.constant 0 : index
    %c0_54 = arith.constant 0 : index
    %120 = vector.load %arg4[%c0_52, %c0_53, %c0_54] : memref<2x8x256xf32, #tpu.memory_space<vmem>>, vector<1x8x256xf32>
    %121 = vector.shape_cast %120 : vector<1x8x256xf32> to vector<8x256xf32>
    %122 = vector.shape_cast %119 : vector<8x256xf32> to vector<1x8x256xf32>
    tpu.vector_store %arg4[%c0_52, %c0_53, %c0_54], %122 {strides = array<i32>} : memref<2x8x256xf32, #tpu.memory_space<vmem>>, vector<1x8x256xf32>,
    %c1_55 = arith.constant 1 : index
    %c0_56 = arith.constant 0 : index
    %c0_57 = arith.constant 0 : index
    %123 = vector.load %arg0[%c1_55, %c0_56, %c0_57] : memref<2x4x256xf32, #tpu.memory_space<vmem>>, vector<1x4x256xf32>
    %124 = vector.shape_cast %123 : vector<1x4x256xf32> to vector<4x256xf32>
    %cst_58 = arith.constant 0.000000e+00 : f32
    %125 = vector.broadcast %cst_58 : f32 to vector<8x256xf32>
    %c0_59 = arith.constant 0 : index
    %c0_60 = arith.constant 0 : index
    %c0_61 = arith.constant 0 : index
    %126 = vector.load %arg1[%c0_59, %c0_60, %c0_61] : memref<9x8x4xf32, #tpu.memory_space<vmem>>, vector<1x8x4xf32>
    %127 = vector.shape_cast %126 : vector<1x8x4xf32> to vector<8x4xf32>
    %cst_62 = arith.constant dense<0.000000e+00> : vector<8x256xf32>
    %128 = tpu.matmul %127, %124, %cst_62 {dimension_numbers = #tpu.dot_dimension_numbers<[1], [0], [0], [1], [0, 0, 1, 1], [], []>} : vector<8x4xf32>, vector<4x256xf32>, vector<8x256xf32> -> vector<8x256xf32>
    %129 = arith.addf %125, %128 : vector<8x256xf32>
    %c255_i32_63 = arith.constant 255 : i32
    %130 = tpu.dynamic_rotate %124 by %c255_i32_63 dim 1 : vector<4x256xf32>, i32 -> vector<4x256xf32>
    %c1_64 = arith.constant 1 : index
    %c0_65 = arith.constant 0 : index
    %c0_66 = arith.constant 0 : index
    %131 = vector.load %arg1[%c1_64, %c0_65, %c0_66] : memref<9x8x4xf32, #tpu.memory_space<vmem>>, vector<1x8x4xf32>
    %132 = vector.shape_cast %131 : vector<1x8x4xf32> to vector<8x4xf32>
    %cst_67 = arith.constant dense<0.000000e+00> : vector<8x256xf32>
    %133 = tpu.matmul %132, %130, %cst_67 {dimension_numbers = #tpu.dot_dimension_numbers<[1], [0], [0], [1], [0, 0, 1, 1], [], []>} : vector<8x4xf32>, vector<4x256xf32>, vector<8x256xf32> -> vector<8x256xf32>
    %134 = arith.addf %129, %133 : vector<8x256xf32>
    %c254_i32_68 = arith.constant 254 : i32
    %135 = tpu.dynamic_rotate %124 by %c254_i32_68 dim 1 : vector<4x256xf32>, i32 -> vector<4x256xf32>
    %c2_69 = arith.constant 2 : index
    %c0_70 = arith.constant 0 : index
    %c0_71 = arith.constant 0 : index
    %136 = vector.load %arg1[%c2_69, %c0_70, %c0_71] : memref<9x8x4xf32, #tpu.memory_space<vmem>>, vector<1x8x4xf32>
    %137 = vector.shape_cast %136 : vector<1x8x4xf32> to vector<8x4xf32>
    %cst_72 = arith.constant dense<0.000000e+00> : vector<8x256xf32>
    %138 = tpu.matmul %137, %135, %cst_72 {dimension_numbers = #tpu.dot_dimension_numbers<[1], [0], [0], [1], [0, 0, 1, 1], [], []>} : vector<8x4xf32>, vector<4x256xf32>, vector<8x256xf32> -> vector<8x256xf32>
    %139 = arith.addf %134, %138 : vector<8x256xf32>
    %c240_i32_73 = arith.constant 240 : i32
    %140 = tpu.dynamic_rotate %124 by %c240_i32_73 dim 1 : vector<4x256xf32>, i32 -> vector<4x256xf32>
    %c3_74 = arith.constant 3 : index
    %c0_75 = arith.constant 0 : index
    %c0_76 = arith.constant 0 : index
    %141 = vector.load %arg1[%c3_74, %c0_75, %c0_76] : memref<9x8x4xf32, #tpu.memory_space<vmem>>, vector<1x8x4xf32>
    %142 = vector.shape_cast %141 : vector<1x8x4xf32> to vector<8x4xf32>
    %cst_77 = arith.constant dense<0.000000e+00> : vector<8x256xf32>
    %143 = tpu.matmul %142, %140, %cst_77 {dimension_numbers = #tpu.dot_dimension_numbers<[1], [0], [0], [1], [0, 0, 1, 1], [], []>} : vector<8x4xf32>, vector<4x256xf32>, vector<8x256xf32> -> vector<8x256xf32>
    %144 = arith.addf %139, %143 : vector<8x256xf32>
    %c239_i32_78 = arith.constant 239 : i32
    %145 = tpu.dynamic_rotate %124 by %c239_i32_78 dim 1 : vector<4x256xf32>, i32 -> vector<4x256xf32>
    %c4_79 = arith.constant 4 : index
    %c0_80 = arith.constant 0 : index
    %c0_81 = arith.constant 0 : index
    %146 = vector.load %arg1[%c4_79, %c0_80, %c0_81] : memref<9x8x4xf32, #tpu.memory_space<vmem>>, vector<1x8x4xf32>
    %147 = vector.shape_cast %146 : vector<1x8x4xf32> to vector<8x4xf32>
    %cst_82 = arith.constant dense<0.000000e+00> : vector<8x256xf32>
    %148 = tpu.matmul %147, %145, %cst_82 {dimension_numbers = #tpu.dot_dimension_numbers<[1], [0], [0], [1], [0, 0, 1, 1], [], []>} : vector<8x4xf32>, vector<4x256xf32>, vector<8x256xf32> -> vector<8x256xf32>
    %149 = arith.addf %144, %148 : vector<8x256xf32>
    %c238_i32_83 = arith.constant 238 : i32
    %150 = tpu.dynamic_rotate %124 by %c238_i32_83 dim 1 : vector<4x256xf32>, i32 -> vector<4x256xf32>
    %c5_84 = arith.constant 5 : index
    %c0_85 = arith.constant 0 : index
    %c0_86 = arith.constant 0 : index
    %151 = vector.load %arg1[%c5_84, %c0_85, %c0_86] : memref<9x8x4xf32, #tpu.memory_space<vmem>>, vector<1x8x4xf32>
    %152 = vector.shape_cast %151 : vector<1x8x4xf32> to vector<8x4xf32>
    %cst_87 = arith.constant dense<0.000000e+00> : vector<8x256xf32>
    %153 = tpu.matmul %152, %150, %cst_87 {dimension_numbers = #tpu.dot_dimension_numbers<[1], [0], [0], [1], [0, 0, 1, 1], [], []>} : vector<8x4xf32>, vector<4x256xf32>, vector<8x256xf32> -> vector<8x256xf32>
    %154 = arith.addf %149, %153 : vector<8x256xf32>
    %c224_i32_88 = arith.constant 224 : i32
    %155 = tpu.dynamic_rotate %124 by %c224_i32_88 dim 1 : vector<4x256xf32>, i32 -> vector<4x256xf32>
    %c6_89 = arith.constant 6 : index
    %c0_90 = arith.constant 0 : index
    %c0_91 = arith.constant 0 : index
    %156 = vector.load %arg1[%c6_89, %c0_90, %c0_91] : memref<9x8x4xf32, #tpu.memory_space<vmem>>, vector<1x8x4xf32>
    %157 = vector.shape_cast %156 : vector<1x8x4xf32> to vector<8x4xf32>
    %cst_92 = arith.constant dense<0.000000e+00> : vector<8x256xf32>
    %158 = tpu.matmul %157, %155, %cst_92 {dimension_numbers = #tpu.dot_dimension_numbers<[1], [0], [0], [1], [0, 0, 1, 1], [], []>} : vector<8x4xf32>, vector<4x256xf32>, vector<8x256xf32> -> vector<8x256xf32>
    %159 = arith.addf %154, %158 : vector<8x256xf32>
    %c223_i32_93 = arith.constant 223 : i32
    %160 = tpu.dynamic_rotate %124 by %c223_i32_93 dim 1 : vector<4x256xf32>, i32 -> vector<4x256xf32>
    %c7_94 = arith.constant 7 : index
    %c0_95 = arith.constant 0 : index
    %c0_96 = arith.constant 0 : index
    %161 = vector.load %arg1[%c7_94, %c0_95, %c0_96] : memref<9x8x4xf32, #tpu.memory_space<vmem>>, vector<1x8x4xf32>
    %162 = vector.shape_cast %161 : vector<1x8x4xf32> to vector<8x4xf32>
    %cst_97 = arith.constant dense<0.000000e+00> : vector<8x256xf32>
    %163 = tpu.matmul %162, %160, %cst_97 {dimension_numbers = #tpu.dot_dimension_numbers<[1], [0], [0], [1], [0, 0, 1, 1], [], []>} : vector<8x4xf32>, vector<4x256xf32>, vector<8x256xf32> -> vector<8x256xf32>
    %164 = arith.addf %159, %163 : vector<8x256xf32>
    %c222_i32_98 = arith.constant 222 : i32
    %165 = tpu.dynamic_rotate %124 by %c222_i32_98 dim 1 : vector<4x256xf32>, i32 -> vector<4x256xf32>
    %c8_99 = arith.constant 8 : index
    %c0_100 = arith.constant 0 : index
    %c0_101 = arith.constant 0 : index
    %166 = vector.load %arg1[%c8_99, %c0_100, %c0_101] : memref<9x8x4xf32, #tpu.memory_space<vmem>>, vector<1x8x4xf32>
    %167 = vector.shape_cast %166 : vector<1x8x4xf32> to vector<8x4xf32>
    %cst_102 = arith.constant dense<0.000000e+00> : vector<8x256xf32>
    %168 = tpu.matmul %167, %165, %cst_102 {dimension_numbers = #tpu.dot_dimension_numbers<[1], [0], [0], [1], [0, 0, 1, 1], [], []>} : vector<8x4xf32>, vector<4x256xf32>, vector<8x256xf32> -> vector<8x256xf32>
    %169 = arith.addf %164, %168 : vector<8x256xf32>
    %170 = vector.broadcast %2 : vector<1x256xf32> to vector<8x256xf32>
    %171 = arith.mulf %169, %170 : vector<8x256xf32>
    %cst_103 = arith.constant dense<0.000000e+00> : vector<8xf32>
    %172 = vector.multi_reduction <add>, %171, %cst_103 [1] : vector<8x256xf32> to vector<8xf32>
    %173 = vector.shape_cast %172 : vector<8xf32> to vector<8x1xf32>
    %174 = arith.mulf %171, %171 : vector<8x256xf32>
    %cst_104 = arith.constant dense<0.000000e+00> : vector<8xf32>
    %175 = vector.multi_reduction <add>, %174, %cst_104 [1] : vector<8x256xf32> to vector<8xf32>
    %176 = vector.shape_cast %175 : vector<8xf32> to vector<8x1xf32>
    %cst_105 = arith.constant 0.000000e+00 : f32
    %177 = vector.broadcast %cst_105 : f32 to vector<8x1xf32>
    %cst_106 = arith.constant 0.000000e+00 : f32
    %178 = vector.broadcast %cst_106 : f32 to vector<8x1xf32>
    %179 = vector.extract_strided_slice %173 {offsets = [0, 0], sizes = [4, 1], strides = [1, 1]} : vector<8x1xf32> to vector<4x1xf32>
    %cst_107 = arith.constant dense<0.000000e+00> : vector<1xf32>
    %180 = vector.multi_reduction <add>, %179, %cst_107 [0] : vector<4x1xf32> to vector<1xf32>
    %181 = vector.shape_cast %180 : vector<1xf32> to vector<1x1xf32>
    %cst_108 = arith.constant 0.00127551018 : f32
    %182 = vector.broadcast %cst_108 : f32 to vector<1x1xf32>
    %183 = arith.mulf %181, %182 : vector<1x1xf32>
    %184 = vector.extract_strided_slice %176 {offsets = [0, 0], sizes = [4, 1], strides = [1, 1]} : vector<8x1xf32> to vector<4x1xf32>
    %cst_109 = arith.constant dense<0.000000e+00> : vector<1xf32>
    %185 = vector.multi_reduction <add>, %184, %cst_109 [0] : vector<4x1xf32> to vector<1xf32>
    %186 = vector.shape_cast %185 : vector<1xf32> to vector<1x1xf32>
    %cst_110 = arith.constant 0.00127551018 : f32
    %187 = vector.broadcast %cst_110 : f32 to vector<1x1xf32>
    %188 = arith.mulf %186, %187 : vector<1x1xf32>
    %c0_i32_111 = arith.constant 0 : i32
    %189 = vector.broadcast %c0_i32_111 : i32 to vector<8x1xi32>
    %190 = arith.cmpi sge, %3, %189 : vector<8x1xi32>
    %c4_i32_112 = arith.constant 4 : i32
    %191 = vector.broadcast %c4_i32_112 : i32 to vector<8x1xi32>
    %192 = arith.cmpi slt, %3, %191 : vector<8x1xi32>
    %193 = arith.andi %190, %192 : vector<8x1xi1>
    %194 = vector.shape_cast %183 : vector<1x1xf32> to vector<1x1xf32>
    %195 = vector.broadcast %194 : vector<1x1xf32> to vector<8x1xf32>
    %196 = arith.select %193, %195, %177 : vector<8x1xi1>, vector<8x1xf32>
    %197 = vector.shape_cast %188 : vector<1x1xf32> to vector<1x1xf32>
    %198 = vector.broadcast %197 : vector<1x1xf32> to vector<8x1xf32>
    %199 = arith.select %193, %198, %178 : vector<8x1xi1>, vector<8x1xf32>
    %200 = vector.extract_strided_slice %173 {offsets = [4, 0], sizes = [4, 1], strides = [1, 1]} : vector<8x1xf32> to vector<4x1xf32>
    %cst_113 = arith.constant dense<0.000000e+00> : vector<1xf32>
    %201 = vector.multi_reduction <add>, %200, %cst_113 [0] : vector<4x1xf32> to vector<1xf32>
    %202 = vector.shape_cast %201 : vector<1xf32> to vector<1x1xf32>
    %cst_114 = arith.constant 0.00127551018 : f32
    %203 = vector.broadcast %cst_114 : f32 to vector<1x1xf32>
    %204 = arith.mulf %202, %203 : vector<1x1xf32>
    %205 = vector.extract_strided_slice %176 {offsets = [4, 0], sizes = [4, 1], strides = [1, 1]} : vector<8x1xf32> to vector<4x1xf32>
    %cst_115 = arith.constant dense<0.000000e+00> : vector<1xf32>
    %206 = vector.multi_reduction <add>, %205, %cst_115 [0] : vector<4x1xf32> to vector<1xf32>
    %207 = vector.shape_cast %206 : vector<1xf32> to vector<1x1xf32>
    %cst_116 = arith.constant 0.00127551018 : f32
    %208 = vector.broadcast %cst_116 : f32 to vector<1x1xf32>
    %209 = arith.mulf %207, %208 : vector<1x1xf32>
    %c4_i32_117 = arith.constant 4 : i32
    %210 = vector.broadcast %c4_i32_117 : i32 to vector<8x1xi32>
    %211 = arith.cmpi sge, %3, %210 : vector<8x1xi32>
    %c8_i32_118 = arith.constant 8 : i32
    %212 = vector.broadcast %c8_i32_118 : i32 to vector<8x1xi32>
    %213 = arith.cmpi slt, %3, %212 : vector<8x1xi32>
    %214 = arith.andi %211, %213 : vector<8x1xi1>
    %215 = vector.shape_cast %204 : vector<1x1xf32> to vector<1x1xf32>
    %216 = vector.broadcast %215 : vector<1x1xf32> to vector<8x1xf32>
    %217 = arith.select %214, %216, %196 : vector<8x1xi1>, vector<8x1xf32>
    %218 = vector.shape_cast %209 : vector<1x1xf32> to vector<1x1xf32>
    %219 = vector.broadcast %218 : vector<1x1xf32> to vector<8x1xf32>
    %220 = arith.select %214, %219, %199 : vector<8x1xi1>, vector<8x1xf32>
    %221 = arith.mulf %217, %217 : vector<8x1xf32>
    %222 = arith.subf %220, %221 : vector<8x1xf32>
    %cst_119 = arith.constant 0.000000e+00 : f32
    %223 = vector.broadcast %cst_119 : f32 to vector<8x1xf32>
    %224 = arith.maximumf %222, %223 : vector<8x1xf32>
    %cst_120 = arith.constant 9.99999974E-6 : f32
    %225 = vector.broadcast %cst_120 : f32 to vector<8x1xf32>
    %226 = arith.addf %224, %225 : vector<8x1xf32>
    %227 = math.rsqrt %226 : vector<8x1xf32>
    %228 = arith.mulf %227, %0 : vector<8x1xf32>
    %229 = arith.mulf %217, %228 : vector<8x1xf32>
    %230 = arith.subf %1, %229 : vector<8x1xf32>
    %231 = vector.broadcast %228 : vector<8x1xf32> to vector<8x256xf32>
    %232 = arith.mulf %169, %231 : vector<8x256xf32>
    %233 = vector.broadcast %230 : vector<8x1xf32> to vector<8x256xf32>
    %234 = arith.addf %232, %233 : vector<8x256xf32>
    %cst_121 = arith.constant 0.000000e+00 : f32
    %235 = vector.broadcast %cst_121 : f32 to vector<8x256xf32>
    %236 = arith.maximumf %234, %235 : vector<8x256xf32>
    %237 = vector.broadcast %2 : vector<1x256xf32> to vector<8x256xf32>
    %238 = arith.mulf %236, %237 : vector<8x256xf32>
    %c1_122 = arith.constant 1 : index
    %c0_123 = arith.constant 0 : index
    %c0_124 = arith.constant 0 : index
    %239 = vector.load %arg4[%c1_122, %c0_123, %c0_124] : memref<2x8x256xf32, #tpu.memory_space<vmem>>, vector<1x8x256xf32>
    %240 = vector.shape_cast %239 : vector<1x8x256xf32> to vector<8x256xf32>
    %241 = vector.shape_cast %238 : vector<8x256xf32> to vector<1x8x256xf32>
    tpu.vector_store %arg4[%c1_122, %c0_123, %c0_124], %241 {strides = array<i32>} : memref<2x8x256xf32, #tpu.memory_space<vmem>>, vector<1x8x256xf32>,
    return
  }
}

</mosaic_0001>

<bundles_post_ra>
// kernel: tpu_custom_call.1
= control target key start
LH: loop header
LB: loop body
LE: loop exit
PB: predicated region body
PF: predicated region fallthrough
CT: control target
= control target key end

     0   :  { %s1948_s17 = smov 126   ;;  %s1949_s18 = smov 127   ;;  %vm42_vm0 = vcmask 1043456   ;;  %v1950_v2 = vmov 0.0   ;;  %s2304_s0 = inlined_call_operand.vmem [shape: f32[2,4,256], index: 0, kind: input, shape index: {}]   ;;  %s2305_s1 = inlined_call_operand.vmem [shape: f32[9,8,4], index: 1, kind: input, shape index: {}]   ;;  %s2306_s2 = inlined_call_operand.vmem [shape: f32[8,2], index: 2, kind: input, shape index: {}]   ;;  %s2307_s3 = inlined_call_operand.vmem [shape: f32[1,256], index: 3, kind: input, shape index: {}]   ;;  %s2308_s4 = inlined_call_operand.hbm [shape: f32[2,8,256], index: 4, kind: output, shape index: {}]  }
   0x1   :  { %v22_v0 = vld [vmem:[%s2304_s0] sm:$0xff]  ;;  %113 = vmatprep.mubr.f32.mxu0 %v1950_v2  ;;  %191 = vmatprep.mubr.f32.mxu1 %v1950_v2 }
   0x2   :  { %198 = vrot.lane.b32.xlu1 %v22_v0, %s1948_s17  ;;  %27 = vrot.lane.b32.xlu0 %v22_v0, %s1949_s18  ;;  %v25_v1 = vcombine.high %v22_v0, %v22_v0 }
   0x3   :  { %9 = vsyncpa [#allocation3], 0  ;;  %v1999_v3 = vld [vmem:[%s2305_s1] sm:$0xff]  ;;  %vm38_vm1 = vcmask 31744   ;;  %s1951_s21 = smov 112   ;;  %s1952_s22 = smov 111   ;;  %v20_v6 = vlaneseq }
   0x4   :  { %1835 = vmatprep.subr.msk.mxu1 %vm42_vm0, %v25_v1  ;;  %s1953_s23 = smov 110   ;;  %s1954_s24 = smov 96   ;;  %v2010_v4 = vld [vmem:[%s2304_s0 + $0x8] sm:$0xff]  ;;  %v2069_v21 = vld [vmem:[%s2305_s1 + $0x10] sm:$0xff]  ;;  %v2074_v22 = vld [vmem:[%s2305_s1 + $0x18] sm:$0xff] }
   0x5   :  { %1836 = vmatpush1.msk.msra.mxu1 %vm42_vm0, %v22_v0  ;;  %s1955_s25 = smov 95   ;;  %s1956_s28 = smov 94   ;;  %v2014_v5 = vcombine.high %v2010_v4, %v2010_v4  ;;  %v2037_v7 = vand.u32 127, %v20_v6  ;;  %v2048_v14 = vld [vmem:[%s2305_s1 + $0x8] sm:$0xff]  ;;  %v2091_v27 = vld [vmem:[%s2305_s1 + $0x20] sm:$0xff]  ;;  %v2121_v37 = vld [vmem:[%s2305_s1 + $0x30] sm:$0xff] }
   0x6   :  { %200 = vrot.lane.b32.xlu1 %v25_v1, %s1948_s17  ;;  %29 = vrot.lane.b32.xlu0 %v25_v1, %s1949_s18  ;;  %v2106_v32 = vld [vmem:[%s2305_s1 + $0x28] sm:$0xff]  ;;  %v2136_v42 = vld [vmem:[%s2305_s1 + $0x38] sm:$0xff]  ;;  %s1959_s20 = smov 1  }
   0x7   :  { %1837 = vmatmul.mubr.msk.f32.vlgmr.msra.gmra.mxu1 %vm38_vm1, %v1999_v3  ;;  %vm33_vm2 = vcmp.lt.s32.totalorder %v2037_v7, 127  ;;  %vm202_vm3 = vcmp.lt.s32.totalorder %v2037_v7, 126  ;;  %vm293_vm4 = vcmp.lt.s32.totalorder %v2037_v7, 112  ;;  %vm384_vm5 = vcmp.lt.s32.totalorder %v2037_v7, 111  ;;  %v2151_v47 = vld [vmem:[%s2305_s1 + $0x40] sm:$0xff] }
   0x8   :  { %371 = vmatprep.mubr.f32.mxu1 %v1950_v2  ;;  %vm475_vm6 = vcmp.lt.s32.totalorder %v2037_v7, 110  ;;  %vm566_vm7 = vcmp.lt.s32.totalorder %v2037_v7, 96  ;;  %vm657_vm8 = vcmp.lt.s32.totalorder %v2037_v7, 95  ;;  %vm748_vm9 = vcmp.lt.s32.totalorder %v2037_v7, 94 }
   0xa   :  { %291 = vrot.lane.b32.xlu1 %v25_v1, %s1951_s21  ;;  %289 = vrot.lane.b32.xlu0 %v22_v0, %s1951_s21 }
   0xe   :  { %382 = vrot.lane.b32.xlu1 %v25_v1, %s1952_s22  ;;  %380 = vrot.lane.b32.xlu0 %v22_v0, %s1952_s22 }
  0x12   :  { %473 = vrot.lane.b32.xlu1 %v25_v1, %s1953_s23  ;;  %471 = vrot.lane.b32.xlu0 %v22_v0, %s1953_s23 }
  0x16   :  { %564 = vrot.lane.b32.xlu1 %v25_v1, %s1954_s24  ;;  %562 = vrot.lane.b32.xlu0 %v22_v0, %s1954_s24 }
  0x1a   :  { %655 = vrot.lane.b32.xlu1 %v25_v1, %s1955_s25  ;;  %653 = vrot.lane.b32.xlu0 %v22_v0, %s1955_s25 }
  0x1e   :  { %746 = vrot.lane.b32.xlu1 %v25_v1, %s1956_s28  ;;  %744 = vrot.lane.b32.xlu0 %v22_v0, %s1956_s28 }
  0x22   :  { %944 = vrot.lane.b32.xlu1 %v2014_v5, %s1949_s18  ;;  %942 = vrot.lane.b32.xlu0 %v2010_v4, %s1949_s18 }
  0x26   :  { %1109 = vrot.lane.b32.xlu1 %v2014_v5, %s1948_s17  ;;  %1107 = vrot.lane.b32.xlu0 %v2010_v4, %s1948_s17 }
  0x2a   :  { %1198 = vrot.lane.b32.xlu1 %v2014_v5, %s1951_s21  ;;  %1196 = vrot.lane.b32.xlu0 %v2010_v4, %s1951_s21 }
  0x2e   :  { %1287 = vrot.lane.b32.xlu1 %v2014_v5, %s1952_s22  ;;  %1285 = vrot.lane.b32.xlu0 %v2010_v4, %s1952_s22 }
  0x32   :  { %1376 = vrot.lane.b32.xlu1 %v2014_v5, %s1953_s23  ;;  %1374 = vrot.lane.b32.xlu0 %v2010_v4, %s1953_s23 }
  0x36   :  { %1465 = vrot.lane.b32.xlu1 %v2014_v5, %s1954_s24  ;;  %1463 = vrot.lane.b32.xlu0 %v2010_v4, %s1954_s24 }
  0x3a   :  { %1554 = vrot.lane.b32.xlu1 %v2014_v5, %s1955_s25  ;;  %1552 = vrot.lane.b32.xlu0 %v2010_v4, %s1955_s25 }
  0x3e   :  { %1643 = vrot.lane.b32.xlu1 %v2014_v5, %s1956_s28  ;;  %1641 = vrot.lane.b32.xlu0 %v2010_v4, %s1956_s28 }
  0x74   :  { %v199_v8 = vpop.permute.xlu1 %198  ;;  %v28_v9 = vpop.permute.xlu0 %27 }
  0x78   :  { %v201_v10 = vpop.permute.xlu1 %200  ;;  %v30_v11 = vpop.permute.xlu0 %29 }
  0x79   :  { %v35_v12 = vsel %vm33_vm2, %v30_v11, %v28_v9  ;;  %v34_v13 = vsel %vm33_vm2, %v28_v9, %v30_v11  ;;  %v204_v15 = vsel %vm202_vm3, %v201_v10, %v199_v8  ;;  %v203_v16 = vsel %vm202_vm3, %v199_v8, %v201_v10 }
  0x7a   :  { %1832 = vmatprep.subr.msk.mxu0 %vm42_vm0, %v35_v12 }
  0x7b   :  { %1833 = vmatpush1.msk.msra.mxu0 %vm42_vm0, %v34_v13 }
  0x7c   :  { %v292_v17 = vpop.permute.xlu1 %291  ;;  %v290_v18 = vpop.permute.xlu0 %289  ;;  %1839 = vmatprep.subr.msk.mxu0 %vm42_vm0, %v204_v15  ;;  %1834 = vmatmul.mubr.msk.f32.vlgmr.msra.gmra.mxu0 %vm38_vm1, %v2048_v14 }
  0x7d   :  { %v294_v19 = vsel %vm293_vm4, %v290_v18, %v292_v17  ;;  %v295_v20 = vsel %vm293_vm4, %v292_v17, %v290_v18  ;;  %1840 = vmatpush1.msk.msra.mxu0 %vm42_vm0, %v203_v16  ;;  %280 = vmatprep.mubr.f32.mxu0 %v1950_v2 }
  0x7e   :  { %1843 = vmatprep.subr.msk.mxu1 %vm42_vm0, %v295_v20 }
  0x7f   :  { %1844 = vmatpush1.msk.msra.mxu1 %vm42_vm0, %v294_v19 }
  0x80   :  { %v383_v23 = vpop.permute.xlu1 %382  ;;  %v381_v24 = vpop.permute.xlu0 %380  ;;  %1841 = vmatmul.mubr.msk.f32.vlgmr.msra.gmra.mxu0 %vm38_vm1, %v2069_v21  ;;  %1845 = vmatmul.mubr.msk.f32.vlgmr.msra.gmra.mxu1 %vm38_vm1, %v2074_v22 }
  0x81   :  { %v385_v25 = vsel %vm384_vm5, %v381_v24, %v383_v23  ;;  %v386_v26 = vsel %vm384_vm5, %v383_v23, %v381_v24  ;;  %462 = vmatprep.mubr.f32.mxu0 %v1950_v2  ;;  %553 = vmatprep.mubr.f32.mxu1 %v1950_v2 }
  0x82   :  { %1847 = vmatprep.subr.msk.mxu0 %vm42_vm0, %v386_v26 }
  0x83   :  { %1848 = vmatpush1.msk.msra.mxu0 %vm42_vm0, %v385_v25 }
  0x84   :  { %v474_v28 = vpop.permute.xlu1 %473  ;;  %v472_v29 = vpop.permute.xlu0 %471  ;;  %1849 = vmatmul.mubr.msk.f32.vlgmr.msra.gmra.mxu0 %vm38_vm1, %v2091_v27 }
  0x85   :  { %v476_v30 = vsel %vm475_vm6, %v472_v29, %v474_v28  ;;  %v477_v31 = vsel %vm475_vm6, %v474_v28, %v472_v29  ;;  %644 = vmatprep.mubr.f32.mxu0 %v1950_v2 }
  0x86   :  { %1851 = vmatprep.subr.msk.mxu1 %vm42_vm0, %v477_v31 }
  0x87   :  { %1852 = vmatpush1.msk.msra.mxu1 %vm42_vm0, %v476_v30 }
  0x88   :  { %v565_v33 = vpop.permute.xlu1 %564  ;;  %v563_v34 = vpop.permute.xlu0 %562  ;;  %1853 = vmatmul.mubr.msk.f32.vlgmr.msra.gmra.mxu1 %vm38_vm1, %v2106_v32 }
  0x89   :  { %v567_v35 = vsel %vm566_vm7, %v563_v34, %v565_v33  ;;  %v568_v36 = vsel %vm566_vm7, %v565_v33, %v563_v34  ;;  %735 = vmatprep.mubr.f32.mxu1 %v1950_v2 }
  0x8a   :  { %1855 = vmatprep.subr.msk.mxu0 %vm42_vm0, %v568_v36 }
  0x8b   :  { %1856 = vmatpush1.msk.msra.mxu0 %vm42_vm0, %v567_v35 }
  0x8c   :  { %v656_v38 = vpop.permute.xlu1 %655  ;;  %v654_v39 = vpop.permute.xlu0 %653  ;;  %1857 = vmatmul.mubr.msk.f32.vlgmr.msra.gmra.mxu0 %vm38_vm1, %v2121_v37 }
  0x8d   :  { %v658_v40 = vsel %vm657_vm8, %v654_v39, %v656_v38  ;;  %v659_v41 = vsel %vm657_vm8, %v656_v38, %v654_v39  ;;  %826 = vmatprep.mubr.f32.mxu0 %v1950_v2  ;;  %v2237_v39 = vshrl.u32 %v20_v6, 7 }
  0x8e   :  { %1859 = vmatprep.subr.msk.mxu1 %vm42_vm0, %v659_v41 }
  0x8f   :  { %1860 = vmatpush1.msk.msra.mxu1 %vm42_vm0, %v658_v40  ;;  %vm873_vm10 = vcmp.lt.s32.totalorder %v2237_v39, 4  ;;  %vm899_vm11 = vcmp.ge.s32.totalorder %v2237_v39, 4 }
  0x90   :  { %v747_v43 = vpop.permute.xlu1 %746  ;;  %v745_v44 = vpop.permute.xlu0 %744  ;;  %1861 = vmatmul.mubr.msk.f32.vlgmr.msra.gmra.mxu1 %vm38_vm1, %v2136_v42 }
  0x91   :  { %v749_v45 = vsel %vm748_vm9, %v745_v44, %v747_v43  ;;  %v750_v46 = vsel %vm748_vm9, %v747_v43, %v745_v44  ;;  %1022 = vmatprep.mubr.f32.mxu1 %v1950_v2  ;;  %v838_v44 = vsub.s32 0, %v2237_v39 }
  0x92   :  { %1863 = vmatprep.subr.msk.mxu0 %vm42_vm0, %v750_v46  ;;  %v19_v46 = vld [vmem:[%s2307_s3] sm:$0x3] }
  0x93   :  { %1864 = vmatpush1.msk.msra.mxu0 %vm42_vm0, %v749_v45 }
  0x94   :  { %v945_v48 = vpop.permute.xlu1 %944  ;;  %v943_v49 = vpop.permute.xlu0 %942  ;;  %1865 = vmatmul.mubr.msk.f32.vlgmr.msra.gmra.mxu0 %vm38_vm1, %v2151_v47  ;;  %1871 = vmatprep.subr.msk.mxu0 %vm42_vm0, %v2014_v5 }
  0x95   :  { %v946_v50 = vsel %vm33_vm2, %v943_v49, %v945_v48  ;;  %v947_v51 = vsel %vm33_vm2, %v945_v48, %v943_v49  ;;  %1872 = vmatpush1.msk.msra.mxu0 %vm42_vm0, %v2010_v4  ;;  %1100 = vmatprep.mubr.f32.mxu0 %v1950_v2  ;;  %v842_v48 = vsub.s32 1, %v2237_v39 }
  0x96   :  { %1868 = vmatprep.subr.msk.mxu1 %vm42_vm0, %v947_v51  ;;  %v2244_v51 = vrot.slane %v19_v46, %v838_v44 }
  0x97   :  { %1869 = vmatpush1.msk.msra.mxu1 %vm42_vm0, %v946_v50 }
  0x98   :  { %v1110_v52 = vpop.permute.xlu1 %1109  ;;  %v1108_v53 = vpop.permute.xlu0 %1107  ;;  %1870 = vmatmul.mubr.msk.f32.vlgmr.msra.gmra.mxu1 %vm38_vm1, %v2048_v14  ;;  %1873 = vmatmul.mubr.msk.f32.vlgmr.msra.gmra.mxu0 %vm38_vm1, %v1999_v3 }
  0x99   :  { %v1111_v54 = vsel %vm202_vm3, %v1108_v53, %v1110_v52  ;;  %v1112_v55 = vsel %vm202_vm3, %v1110_v52, %v1108_v53  ;;  %1187 = vmatprep.mubr.f32.mxu1 %v1950_v2  ;;  %1276 = vmatprep.mubr.f32.mxu0 %v1950_v2  ;;  %v2248_v53 = vrot.slane %v19_v46, %v842_v48 }
  0x9a   :  { %1875 = vmatprep.subr.msk.mxu1 %vm42_vm0, %v1112_v55 }
  0x9b   :  { %1876 = vmatpush1.msk.msra.mxu1 %vm42_vm0, %v1111_v54 }
  0x9c   :  { %v1199_v56 = vpop.permute.xlu1 %1198  ;;  %v1197_v57 = vpop.permute.xlu0 %1196  ;;  %1877 = vmatmul.mubr.msk.f32.vlgmr.msra.gmra.mxu1 %vm38_vm1, %v2069_v21 }
  0x9d   :  { %v1200_v58 = vsel %vm293_vm4, %v1197_v57, %v1199_v56  ;;  %v1201_v59 = vsel %vm293_vm4, %v1199_v56, %v1197_v57  ;;  %1365 = vmatprep.mubr.f32.mxu1 %v1950_v2 }
  0x9e   :  { %1879 = vmatprep.subr.msk.mxu0 %vm42_vm0, %v1201_v59 }
  0x9f   :  { %1880 = vmatpush1.msk.msra.mxu0 %vm42_vm0, %v1200_v58 }
  0xa0   :  { %v1288_v60 = vpop.permute.xlu1 %1287  ;;  %v1286_v61 = vpop.permute.xlu0 %1285  ;;  %1881 = vmatmul.mubr.msk.f32.vlgmr.msra.gmra.mxu0 %vm38_vm1, %v2074_v22 }
  0xa1   :  { %v1289_v62 = vsel %vm384_vm5, %v1286_v61, %v1288_v60  ;;  %v1290_v63 = vsel %vm384_vm5, %v1288_v60, %v1286_v61  ;;  %1454 = vmatprep.mubr.f32.mxu0 %v1950_v2 }
  0xa2   :  { %1883 = vmatprep.subr.msk.mxu1 %vm42_vm0, %v1290_v63 }
  0xa3   :  { %1884 = vmatpush1.msk.msra.mxu1 %vm42_vm0, %v1289_v62 }
  0xa4   :  { %v1377_v0 = vpop.permute.xlu1 %1376  ;;  %v1375_v1 = vpop.permute.xlu0 %1374  ;;  %1885 = vmatmul.mubr.msk.f32.vlgmr.msra.gmra.mxu1 %vm38_vm1, %v2091_v27 }
  0xa5   :  { %v1378_v3 = vsel %vm475_vm6, %v1375_v1, %v1377_v0  ;;  %v1379_v4 = vsel %vm475_vm6, %v1377_v0, %v1375_v1  ;;  %1543 = vmatprep.mubr.f32.mxu1 %v1950_v2 }
  0xa6   :  { %1887 = vmatprep.subr.msk.mxu0 %vm42_vm0, %v1379_v4 }
  0xa7   :  { %1888 = vmatpush1.msk.msra.mxu0 %vm42_vm0, %v1378_v3 }
  0xa8   :  { %v1466_v5 = vpop.permute.xlu1 %1465  ;;  %v1464_v8 = vpop.permute.xlu0 %1463  ;;  %1889 = vmatmul.mubr.msk.f32.vlgmr.msra.gmra.mxu0 %vm38_vm1, %v2106_v32 }
  0xa9   :  { %v1467_v9 = vsel %vm566_vm7, %v1464_v8, %v1466_v5  ;;  %v1468_v10 = vsel %vm566_vm7, %v1466_v5, %v1464_v8  ;;  %1632 = vmatprep.mubr.f32.mxu0 %v1950_v2 }
  0xaa   :  { %1891 = vmatprep.subr.msk.mxu1 %vm42_vm0, %v1468_v10 }
  0xab   :  { %1892 = vmatpush1.msk.msra.mxu1 %vm42_vm0, %v1467_v9 }
  0xac   :  { %v1555_v11 = vpop.permute.xlu1 %1554  ;;  %v1553_v12 = vpop.permute.xlu0 %1552  ;;  %1893 = vmatmul.mubr.msk.f32.vlgmr.msra.gmra.mxu1 %vm38_vm1, %v2121_v37 }
  0xad   :  { %v1556_v13 = vsel %vm657_vm8, %v1553_v12, %v1555_v11  ;;  %v1557_v14 = vsel %vm657_vm8, %v1555_v11, %v1553_v12  ;;  %1721 = vmatprep.mubr.f32.mxu1 %v1950_v2 }
  0xae   :  { %1895 = vmatprep.subr.msk.mxu0 %vm42_vm0, %v1557_v14 }
  0xaf   :  { %1896 = vmatpush1.msk.msra.mxu0 %vm42_vm0, %v1556_v13 }
  0xb0   :  { %v1644_v15 = vpop.permute.xlu1 %1643  ;;  %v1642_v16 = vpop.permute.xlu0 %1641  ;;  %1897 = vmatmul.mubr.msk.f32.vlgmr.msra.gmra.mxu0 %vm38_vm1, %v2136_v42 }
  0xb1   :  { %v1645_v17 = vsel %vm748_vm9, %v1642_v16, %v1644_v15  ;;  %v1646_v18 = vsel %vm748_vm9, %v1644_v15, %v1642_v16 }
  0xb2   :  { %1899 = vmatprep.subr.msk.mxu1 %vm42_vm0, %v1646_v18 }
  0xb3   :  { %1900 = vmatpush1.msk.msra.mxu1 %vm42_vm0, %v1645_v17 }
  0xb4   :  { %1901 = vmatmul.mubr.msk.f32.vlgmr.msra.gmra.mxu1 %vm38_vm1, %v2151_v47 }
  0xc7   :  { %v193_v2 = vpop.f32.mrf.mxu1 }
  0xc9   :  { %v195_v20 = vpop.f32.mrf.mxu1 }
 0x13c   :  { %v115_v19 = vpop.f32.mrf.mxu0 }
 0x13d   :  { %v194_v21 = vadd.f32 %v193_v2, %v115_v19 }
 0x13e   :  { %v117_v22 = vpop.f32.mrf.mxu0 }
 0x13f   :  { %v196_v23 = vadd.f32 %v195_v20, %v117_v22 }
 0x140   :  { %v282_v24 = vpop.f32.mrf.mxu0  ;;  %v373_v25 = vpop.f32.mrf.mxu1 }
 0x141   :  { %v287_v26 = vadd.f32 %v282_v24, %v194_v21 }
 0x142   :  { %v284_v27 = vpop.f32.mrf.mxu0  ;;  %v375_v28 = vpop.f32.mrf.mxu1 }
 0x143   :  { %v288_v7 = vadd.f32 %v284_v27, %v196_v23  ;;  %v378_v29 = vadd.f32 %v373_v25, %v287_v26 }
 0x144   :  { %v464_v30 = vpop.f32.mrf.mxu0 }
 0x145   :  { %v379_v31 = vadd.f32 %v375_v28, %v288_v7  ;;  %v469_v32 = vadd.f32 %v464_v30, %v378_v29 }
 0x146   :  { %v466_v33 = vpop.f32.mrf.mxu0 }
 0x147   :  { %v470_v34 = vadd.f32 %v466_v33, %v379_v31 }
 0x148   :  { %v555_v35 = vpop.f32.mrf.mxu1 }
 0x149   :  { %v560_v36 = vadd.f32 %v555_v35, %v469_v32 }
 0x14a   :  { %v557_v37 = vpop.f32.mrf.mxu1 }
 0x14b   :  { %v561_v38 = vadd.f32 %v557_v37, %v470_v34 }
 0x14c   :  { %v646_v40 = vpop.f32.mrf.mxu0 }
 0x14d   :  { %v651_v41 = vadd.f32 %v646_v40, %v560_v36  ;;  %v1957_v40 = vmov 0  }
 0x14e   :  { %v648_v42 = vpop.f32.mrf.mxu0  ;;  %1917 = vset.pattern.permute.xlu1 %v1957_v40 }
 0x14f   :  { %v652_v43 = vadd.f32 %v648_v42, %v561_v38 }
 0x150   :  { %v737_v45 = vpop.f32.mrf.mxu1 }
 0x151   :  { %v742_v47 = vadd.f32 %v737_v45, %v651_v41 }
 0x152   :  { %v739_v49 = vpop.f32.mrf.mxu1 }
 0x153   :  { %v743_v50 = vadd.f32 %v739_v49, %v652_v43 }
 0x154   :  { %v828_v6 = vpop.f32.mrf.mxu0 }
 0x155   :  { %v2246_v52 = vadd.f32 %v828_v6, %v742_v47 }
 0x156   :  { %v830_v54 = vpop.f32.mrf.mxu0 }
 0x157   :  { %v846_v55 = vmul.f32 %v2244_v51, %v2246_v52  ;;  %v2252_v56 = vadd.f32 %v830_v54, %v743_v50 }
 0x158   :  { %v1024_v57 = vpop.f32.mrf.mxu1  ;;  %v1102_v58 = vpop.f32.mrf.mxu0 }
 0x159   :  { %v847_v59 = vmul.f32 %v2248_v53, %v2252_v56  ;;  %v851_v60 = vmul.f32 %v846_v55, %v846_v55  ;;  %v1103_v0 = vadd.f32 %v1102_v58, %v1024_v57 }
 0x15a   :  { %v1026_v61 = vpop.f32.mrf.mxu1  ;;  %v1104_v1 = vpop.f32.mrf.mxu0 }
 0x15b   :  { %v848_v62 = vadd.f32 %v847_v59, %v846_v55  ;;  %v852_v63 = vmul.f32 %v847_v59, %v847_v59  ;;  %v1105_v5 = vadd.f32 %v1104_v1, %v1026_v61 }
 0x15c   :  { %v1189_v3 = vpop.f32.mrf.mxu1 }
 0x15d   :  { %849 = vadd.xlane.f32.xlu0 %v848_v62  ;;  %v853_v4 = vadd.f32 %v852_v63, %v851_v60  ;;  %v1194_v8 = vadd.f32 %v1189_v3, %v1103_v0 }
 0x15e   :  { %v1191_v9 = vpop.f32.mrf.mxu1 }
 0x15f   :  { %v1195_v11 = vadd.f32 %v1191_v9, %v1105_v5 }
 0x160   :  { %v1278_v10 = vpop.f32.mrf.mxu0 }
 0x161   :  { %854 = vadd.xlane.f32.xlu0 %v853_v4  ;;  %v1283_v12 = vadd.f32 %v1278_v10, %v1194_v8 }
 0x162   :  { %v1280_v13 = vpop.f32.mrf.mxu0 }
 0x163   :  { %v1284_v15 = vadd.f32 %v1280_v13, %v1195_v11 }
 0x164   :  { %v1367_v14 = vpop.f32.mrf.mxu1 }
 0x165   :  { %v1372_v16 = vadd.f32 %v1367_v14, %v1283_v12 }
 0x166   :  { %v1369_v17 = vpop.f32.mrf.mxu1 }
 0x167   :  { %v1373_v2 = vadd.f32 %v1369_v17, %v1284_v15 }
 0x168   :  { %v1456_v18 = vpop.f32.mrf.mxu0 }
 0x169   :  { %v1461_v19 = vadd.f32 %v1456_v18, %v1372_v16 }
 0x16a   :  { %v1458_v20 = vpop.f32.mrf.mxu0 }
 0x16b   :  { %v1462_v22 = vadd.f32 %v1458_v20, %v1373_v2 }
 0x16c   :  { %v1545_v21 = vpop.f32.mrf.mxu1 }
 0x16d   :  { %v1550_v23 = vadd.f32 %v1545_v21, %v1461_v19 }
 0x16e   :  { %v1547_v24 = vpop.f32.mrf.mxu1 }
 0x16f   :  { %v1551_v27 = vadd.f32 %v1547_v24, %v1462_v22 }
 0x170   :  { %v1634_v25 = vpop.f32.mrf.mxu0 }
 0x171   :  { %v1639_v28 = vadd.f32 %v1634_v25, %v1550_v23 }
 0x172   :  { %v1636_v26 = vpop.f32.mrf.mxu0 }
 0x173   :  { %v1640_v29 = vadd.f32 %v1636_v26, %v1551_v27 }
 0x174   :  { %v1723_v7 = vpop.f32.mrf.mxu1 }
 0x175   :  { %v2256_v30 = vadd.f32 %v1723_v7, %v1639_v28 }
 0x176   :  { %v1725_v31 = vpop.f32.mrf.mxu1 }
 0x177   :  { %v1730_v32 = vmul.f32 %v2256_v30, %v2244_v51  ;;  %v2260_v33 = vadd.f32 %v1725_v31, %v1640_v29 }
 0x179   :  { %v1731_v34 = vmul.f32 %v2260_v33, %v2248_v53  ;;  %v1735_v36 = vmul.f32 %v1730_v32, %v1730_v32 }
 0x17b   :  { %v1732_v35 = vadd.f32 %v1731_v34, %v1730_v32  ;;  %v1736_v37 = vmul.f32 %v1731_v34, %v1731_v34 }
 0x17d   :  { %1733 = vadd.xlane.f32.xlu1 %v1732_v35  ;;  %v1737_v38 = vadd.f32 %v1736_v37, %v1735_v36  ;;  %v1958_v35 = vmov 1  }
 0x17e   :  { %1918 = vset.pattern.permute.xlu0 %v1958_v35 }
 0x17f   :  { %1738 = vadd.xlane.f32.xlu0 %v1737_v38 }
 0x1e6   :  { %v850_v41 = vpop.xlane.xlu0 %849 }
 0x1e7   :  { %v856_v42 = vsel %vm42_vm0, %v850_v41, 0.0  ;;  %v878_v43 = vrot.slane %v850_v41, 4 }
 0x1e8   :  { %v857_v44 = vrot.slane %v856_v42, 4 }
 0x1e9   :  { %v880_v45 = vsel %vm42_vm0, %v878_v43, 0.0 }
 0x1ea   :  { %v858_v46 = vadd.f32 %v857_v44, %v856_v42  ;;  %v881_v47 = vrot.slane %v880_v45, 4  ;;  %v855_v48 = vpop.xlane.xlu0 %854 }
 0x1eb   :  { %v864_v49 = vsel %vm42_vm0, %v855_v48, 0.0  ;;  %v889_v50 = vrot.slane %v855_v48, 4 }
 0x1ec   :  { %v859_v6 = vrot.slane %v858_v46, 2  ;;  %v882_v54 = vadd.f32 %v881_v47, %v880_v45  ;;  %v865_v55 = vrot.slane %v864_v49, 4 }
 0x1ed   :  { %v891_v57 = vsel %vm42_vm0, %v889_v50, 0.0 }
 0x1ee   :  { %v860_v58 = vadd.f32 %v859_v6, %v858_v46  ;;  %v883_v59 = vrot.slane %v882_v54, 2  ;;  %v866_v60 = vadd.f32 %v865_v55, %v864_v49  ;;  %v892_v61 = vrot.slane %v891_v57, 4  ;;  %v18_v49 = vld [vmem:[%s2306_s2] sm:$0xff]  ;;  %s1960_s2 = smov [#allocation2]  }
 0x1ef   :  { %s1820_s21 = sshll.u32 %s1960_s2, 4  ;;  %s1821_s21 = int_to_ptr.vmem [resolvable:$true] %s1820_s21 }
 0x1f0   :  { %v861_v62 = vrot.slane %v860_v58, 1  ;;  %v884_v63 = vadd.f32 %v883_v59, %v882_v54  ;;  %v867_v0 = vrot.slane %v866_v60, 2  ;;  %v893_v1 = vadd.f32 %v892_v61, %v891_v57  ;;  %s1926_s22 = scalar_lea.vmem %s1821_s21, 512  ;;  %p1931_p1 = scmp.lt.s32.totalorder %s1821_s21, %s1821_s21 }
 0x1f1   :  { %p1927_p0 = scmp.ne.s32.totalorder %s1821_s21, %s1926_s22  ;;  %p1932_p2 = scmp.lt.s32.totalorder %s1926_s22, %s1926_s22 }
 0x1f2   :  { %v862_v3 = vadd.f32 %v861_v62, %v860_v58  ;;  %v885_v4 = vrot.slane %v884_v63, 1  ;;  %v868_v5 = vadd.f32 %v867_v0, %v866_v60  ;;  %v894_v8 = vrot.slane %v893_v1, 2 }
 0x1f3   :  { %p1933_p3 = por %p1932_p2, %p1931_p1 }
 0x1f4   :  { %v863_v9 = vmul.f32 0.0012755102, %v862_v3  ;;  %v886_v10 = vadd.f32 %v885_v4, %v884_v63  ;;  %v869_v11 = vrot.slane %v868_v5, 1  ;;  %v895_v12 = vadd.f32 %v894_v8, %v893_v1 }
 0x1f5   :  { %p1934_p4 = pnand %p1933_p3, %p1927_p0 }
 0x1f6   :  { %v887_v13 = vmul.f32 0.0012755102, %v886_v10  ;;  %v870_v14 = vadd.f32 %v869_v11, %v868_v5  ;;  %v896_v15 = vrot.slane %v895_v12, 1  ;;  %v875_v16 = vsel %vm873_vm10, %v863_v9, 0.0 }
 0x1f8   :  { %v871_v17 = vmul.f32 0.0012755102, %v870_v14  ;;  %v897_v18 = vadd.f32 %v896_v15, %v895_v12  ;;  %v902_v2 = vsel %vm899_vm11, %v887_v13, %v875_v16 }
 0x1f9   :  { %v904_v19 = vmul.f32 %v902_v2, %v902_v2 }
 0x1fa   :  { %v876_v20 = vsel %vm873_vm10, %v871_v17, 0.0  ;;  %v898_v21 = vmul.f32 0.0012755102, %v897_v18 }
 0x1fc   :  { %v903_v22 = vsel %vm899_vm11, %v898_v21, %v876_v20 }
 0x1fd   :  { %v905_v23 = vsub.f32 %v903_v22, %v904_v19 }
 0x1ff   :  { %v906_v24 = vmax.f32 %v905_v23, 0.0 }
 0x201   :  { %v907_v25 = vadd.f32 1e-05, %v906_v24 }
 0x203   :  { %1922 = vrsqrt.f32 %v907_v25 }
 0x206   :  { %v1734_v26 = vpop.xlane.xlu1 %1733 }
 0x207   :  { %v1740_v27 = vsel %vm42_vm0, %v1734_v26, 0.0  ;;  %v1759_v28 = vrot.slane %v1734_v26, 4 }
 0x208   :  { %v1741_v7 = vrot.slane %v1740_v27, 4  ;;  %v1739_v29 = vpop.xlane.xlu0 %1738 }
 0x209   :  { %v1761_v31 = vsel %vm42_vm0, %v1759_v28, 0.0  ;;  %v1748_v32 = vsel %vm42_vm0, %v1739_v29, 0.0  ;;  %v1770_v34 = vrot.slane %v1739_v29, 4 }
 0x20a   :  { %v1742_v36 = vadd.f32 %v1741_v7, %v1740_v27  ;;  %v1762_v37 = vrot.slane %v1761_v31, 4  ;;  %v1749_v38 = vrot.slane %v1748_v32, 4 }
 0x20b   :  { %v1772_v40 = vsel %vm42_vm0, %v1770_v34, 0.0 }
 0x20c   :  { %v1743_v41 = vrot.slane %v1742_v36, 2  ;;  %v1763_v42 = vadd.f32 %v1762_v37, %v1761_v31  ;;  %v1750_v43 = vadd.f32 %v1749_v38, %v1748_v32  ;;  %v1773_v44 = vrot.slane %v1772_v40, 4 }
 0x20e   :  { %v1744_v45 = vadd.f32 %v1743_v41, %v1742_v36  ;;  %v1764_v46 = vrot.slane %v1763_v42, 2  ;;  %v1751_v47 = vrot.slane %v1750_v43, 2  ;;  %v1774_v48 = vadd.f32 %v1773_v44, %v1772_v40 }
 0x210   :  { %v1923_v50 = vpop.eup %1922  ;;  %v1745_v6 = vrot.slane %v1744_v45, 1  ;;  %v1765_v54 = vadd.f32 %v1764_v46, %v1763_v42  ;;  %v1752_v55 = vadd.f32 %v1751_v47, %v1750_v43  ;;  %v1775_v57 = vrot.slane %v1774_v48, 2 }
 0x211   :  { %v909_v58 = vmul.f32 %v1923_v50, %v18_v49 }
 0x212   :  { %v1746_v59 = vadd.f32 %v1745_v6, %v1744_v45  ;;  %v1766_v60 = vrot.slane %v1765_v54, 1  ;;  %v1753_v61 = vrot.slane %v1752_v55, 1  ;;  %v1776_v62 = vadd.f32 %v1775_v57, %v1774_v48 }
 0x213   :  { %v910_v63 = vmul.f32 %v909_v58, %v902_v2 }
 0x214   :  { %v1747_v0 = vmul.f32 0.0012755102, %v1746_v59  ;;  %v1767_v1 = vadd.f32 %v1766_v60, %v1765_v54  ;;  %v1754_v3 = vadd.f32 %v1753_v61, %v1752_v55  ;;  %v1777_v4 = vrot.slane %v1776_v62, 1 }
 0x215   :  { %912 = vrot.lane.b32.xlu1 %v910_v63, %s1959_s20 }
 0x216   :  { %v1756_v5 = vsel %vm873_vm10, %v1747_v0, 0.0  ;;  %v1768_v8 = vmul.f32 0.0012755102, %v1767_v1  ;;  %v1755_v9 = vmul.f32 0.0012755102, %v1754_v3  ;;  %v1778_v10 = vadd.f32 %v1777_v4, %v1776_v62 }
 0x218   :  { %v1757_v11 = vsel %vm873_vm10, %v1755_v9, 0.0  ;;  %v1779_v12 = vmul.f32 0.0012755102, %v1778_v10  ;;  %v1780_v13 = vsel %vm899_vm11, %v1768_v8, %v1756_v5 }
 0x219   :  { %v1782_v14 = vmul.f32 %v1780_v13, %v1780_v13  ;;  %918 = vperm.xlu1 %1917, %v909_v58  }
 0x21a   :  { %v1781_v15 = vsel %vm899_vm11, %v1779_v12, %v1757_v11 }
 0x21b   :  { %v1783_v16 = vsub.f32 %v1781_v15, %v1782_v14 }
 0x21d   :  { %v1784_v17 = vmax.f32 %v1783_v16, 0.0 }
 0x21f   :  { %v1785_v18 = vadd.f32 1e-05, %v1784_v17 }
 0x221   :  { %1924 = vrsqrt.f32 %v1785_v18 }
 0x22e   :  { %v1925_v2 = vpop.eup %1924 }
 0x22f   :  { %v1787_v19 = vmul.f32 %v1925_v2, %v18_v49 }
 0x231   :  { %1796 = vperm.xlu1 %1917, %v1787_v19   ;;  %v1788_v20 = vmul.f32 %v1787_v19, %v1780_v13 }
 0x233   :  { %1790 = vrot.lane.b32.xlu0 %v1788_v20, %s1959_s20 }
 0x235   :  { %1919 = vset.pattern.permute.xlu1 %v1958_v35 }
 0x287   :  { %v913_v21 = vpop.permute.xlu1 %912 }
 0x288   :  { %v915_v22 = vsub.f32 %v18_v49, %v913_v21 }
 0x28a   :  { %925 = vperm.xlu0 %1918, %v915_v22  }
 0x294   :  { %v919_v25 = vpop.permute.xlu1 %918 }
 0x295   :  { %v921_v39 = vmul.f32 %v919_v25, %v2246_v52  ;;  %v922_v26 = vmul.f32 %v919_v25, %v2252_v56 }
 0x2a5   :  { %v1791_v23 = vpop.permute.xlu0 %1790 }
 0x2a6   :  { %v1793_v24 = vsub.f32 %v18_v49, %v1791_v23 }
 0x2a8   :  { %1803 = vperm.xlu1 %1919, %v1793_v24  }
 0x2ac   :  { %v1797_v35 = vpop.permute.xlu1 %1796 }
 0x2ad   :  { %v1799_v36 = vmul.f32 %v1797_v35, %v2256_v30  ;;  %v1800_v37 = vmul.f32 %v1797_v35, %v2260_v33 }
 0x305   :  { %v926_v27 = vpop.permute.xlu0 %925 }
 0x306   :  { %v928_v28 = vadd.f32 %v926_v27, %v921_v39  ;;  %v929_v7 = vadd.f32 %v926_v27, %v922_v26 }
 0x308   :  { %v930_v29 = vmax.f32 %v928_v28, 0.0  ;;  %v931_v31 = vmax.f32 %v929_v7, 0.0 }
 0x30a   :  { %v932_v32 = vmul.f32 %v930_v29, %v2244_v51  ;;  %v933_v34 = vmul.f32 %v931_v31, %v2248_v53 }
 0x30c   :  { %934 = vst [vmem:[#allocation2] sm:$0xff] %v932_v32  ;;  %935 = vst [vmem:[#allocation2 + $0x8] sm:$0xff] %v933_v34 }
 0x323   :  { %v1804_v38 = vpop.permute.xlu1 %1803 }
 0x324   :  { %v1806_v52 = vadd.f32 %v1804_v38, %v1799_v36  ;;  %v1807_v40 = vadd.f32 %v1804_v38, %v1800_v37 }
 0x326   :  { %v1808_v56 = vmax.f32 %v1806_v52, 0.0  ;;  %v1809_v41 = vmax.f32 %v1807_v40, 0.0 }
 0x328   :  { %v1810_v42 = vmul.f32 %v1808_v56, %v2244_v51  ;;  %v1811_v43 = vmul.f32 %v1809_v41, %v2248_v53 }
 0x32a   :  { %1813 = vst [vmem:[#allocation2 + $0x10] sm:$0xff] %v1810_v42  ;;  %1814 = vst [vmem:[#allocation2 + $0x18] sm:$0xff] %v1811_v43 }
 0x32b   :  { %1937 = shalt.err (!%p1934_p4)
}
 0x32c   :  { %s1961_s23 = smov 256   ;;  %s1962_s24 = smov 16  }
 0x32d   :  { %1826 = dma.vmem_to_hbm [thread:$0]  %s1821_s21, 512, %s2308_s4, [#allocation3], %s1961_s23, %s1961_s23, %s1962_s24  }
 0x32e   :  { %1946 = dma.done.wait [#allocation3], 512  }
 0x32f   :  { %1947 = vsyncadd [#allocation3], 4294966784 }
 0x330   :  { %1830 = vsyncpa [#allocation3], 1 }

</bundles_post_ra>
